<compile_context>
chip_gen: v6e
topology: v6e:2x2x1
jax: 0.10.0
libtpu: 0.0.40
codegen_flags: <defaults>
</compile_context>

<pallas_src>
import jax
import jax.numpy as jnp
from jax.experimental import pallas as pl
from jax.experimental.pallas import tpu as pltpu

LANE = 128
# 4096 rows x 128 lanes f32 = 2 MiB / input block; 2 inputs x 3 bufs = 12 MiB.
DEFAULT_BLOCK_ROWS = 4096
_VMEM_LIMIT_BYTES = 32 * 1024 * 1024  # below physical VMEM on every chip


def _tensorcores_per_chip():
    """2 TensorCores per chip on v7x; 1 on v5e / v6e."""
    try:
        kind = jax.devices()[0].device_kind.lower()
    except Exception:
        return 1
    return 2 if "v7" in kind else 1


def _make_l1_kernel(block_rows, total_rows, tiles, tiles_per_core, needs_mask,
                    acc_is_small):
    groups = block_rows // 8 if acc_is_small else 1

    def _partial(ad):
        # Fold the (block_rows, 128) |x-y| block down to one (8, 128) vreg tile
        # with pure VPU vreg adds (no XLU): the reshape is a tile relabel only.
        if acc_is_small:
            return ad.reshape(groups, 8, LANE).sum(axis=0)
        return ad

    def kernel(x_ref, y_ref, o_ref, acc_ref):
        i = pl.program_id(1)

        @pl.when(i == 0)
        def _init():
            acc_ref[...] = jnp.zeros_like(acc_ref)

        # Pure VPU elementwise work; f32 cast (for bf16/fp8 inputs) in-register.
        ad = jnp.abs(x_ref[...].astype(jnp.float32) - y_ref[...].astype(jnp.float32))

        if needs_mask:
            # NOTE: must stay in sync with the index_map clamp in _l1_sum_2d —
            # the mask uses the UNclamped block id so phantom blocks (clamped
            # to tiles-1 by the index_map) are fully zeroed here.
            blk = pl.program_id(0) * tiles_per_core + i

            @pl.when(blk < tiles - 1)
            def _interior():  # full interior block: no mask work
                acc_ref[...] += _partial(ad)

            @pl.when(blk >= tiles - 1)
            def _edge():      # ragged last tile and/or clamped phantom block
                row_ids = blk * block_rows + jax.lax.broadcasted_iota(
                    jnp.int32, (block_rows, LANE), 0)
                acc_ref[...] += _partial(jnp.where(row_ids < total_rows, ad, 0.0))
        else:
            acc_ref[...] += _partial(ad)

        @pl.when(i == pl.num_programs(1) - 1)
        def _finalize():
            # single cross-lane/sublane reduction per core, once
            o_ref[0, 0] = jnp.sum(acc_ref[...])

    return kernel


def _l1_sum_2d(x2, y2, rows, block_rows):
    itemsize = jnp.dtype(x2.dtype).itemsize
    # keep sub-32-bit dtypes on their native packed sublane tiling
    packing = 8 * max(1, 4 // itemsize)   # 8 f32, 16 bf16, 32 int8/fp8

    br = min(block_rows, rows)
    if br < rows:
        br = max(packing, (br // packing) * packing)
    tiles = -(-rows // br)

    # 2-way TensorCore split only where it exists (v7x); on v5e/v6e it would
    # just add a phantom-block DMA + mask work whenever `tiles` is odd.
    n_cores = 2 if (_tensorcores_per_chip() >= 2 and tiles >= 2) else 1
    tiles_per_core = -(-tiles // n_cores)
    has_phantom = n_cores * tiles_per_core != tiles
    needs_mask = (rows % br != 0) or has_phantom

    if has_phantom:
        # clamp phantom blocks to a valid block; the in-kernel mask zeroes them
        def in_map(c, i):
            return (jnp.minimum(c * tiles_per_core + i, tiles - 1), 0)
    else:
        def in_map(c, i):
            return (c * tiles_per_core + i, 0)

    acc_is_small = (br % 8 == 0)
    acc_rows = 8 if acc_is_small else br

    def _mk_in_spec():
        if tiles_per_core >= 3:
            # 3-deep buffering hides DMA issue latency on long streaming runs
            return pl.BlockSpec((br, LANE), in_map, pipeline_mode=pl.Buffered(3))
        return pl.BlockSpec((br, LANE), in_map)

    kernel = _make_l1_kernel(br, rows, tiles, tiles_per_core, needs_mask,
                             acc_is_small)

    n_elems = rows * LANE
    cost = pl.CostEstimate(
        flops=3 * n_elems,
        transcendentals=0,
        bytes_accessed=2 * n_elems * itemsize + 4 * n_cores,
    )

    partials = pl.pallas_call(
        kernel,
        out_shape=jax.ShapeDtypeStruct((n_cores, 1), jnp.float32),
        grid_spec=pltpu.PrefetchScalarGridSpec(
            num_scalar_prefetch=0,
            grid=(n_cores, tiles_per_core),
            in_specs=[_mk_in_spec(), _mk_in_spec()],
            out_specs=pl.BlockSpec(
                (1, 1), lambda c, i: (c, 0), memory_space=pltpu.SMEM
            ),
            scratch_shapes=[pltpu.VMEM((acc_rows, LANE), jnp.float32)],
        ),
        compiler_params=pltpu.CompilerParams(
            # TODO(synk): verify in a profile that the leading axis really
            # shards across both v7x TensorCores ("parallel" vs CORE_PARALLEL).
            dimension_semantics=("parallel", "arbitrary"),
            vmem_limit_bytes=_VMEM_LIMIT_BYTES,
        ),
        cost_estimate=cost,
    )(x2, y2)

    return jnp.sum(partials)


def lp_l1_loss(x, y, *, block_rows=DEFAULT_BLOCK_ROWS):
    """Equivalent of nn.L1Loss(reduction='sum')(x, y) / x.shape[0]."""
    assert x.shape == y.shape, "L1Loss requires matching shapes"
    b = x.shape[0]

    n = x.size
    xf = jnp.ravel(x)  # native dtype; f32 cast happens inside the kernel
    yf = jnp.ravel(y)

    rem = n % LANE
    bulk = n - rem

    total = jnp.float32(0.0)
    if bulk:
        rows = bulk // LANE
        x2 = (xf if rem == 0 else xf[:bulk]).reshape(rows, LANE)
        y2 = (yf if rem == 0 else yf[:bulk]).reshape(rows, LANE)
        total = _l1_sum_2d(x2, y2, rows, block_rows)
    if rem:
        # ragged tail (< 128 elements): negligible, handled outside the kernel
        total = total + jnp.sum(
            jnp.abs(xf[bulk:].astype(jnp.float32) - yf[bulk:].astype(jnp.float32))
        )

    return total / jnp.float32(b)


if __name__ == "__main__":
    keys = jax.random.split(jax.random.PRNGKey(0), 4)

    # Small shape consistent with the module's forward (x, y same shape).
    x = jax.random.normal(keys[0], (2, 4, 16, 16), dtype=jnp.float32)
    y = jax.random.normal(keys[1], (2, 4, 16, 16), dtype=jnp.float32)
    out = jax.block_until_ready(lp_l1_loss(x, y))
    ref = jnp.sum(jnp.abs(x - y)) / x.shape[0]
    assert jnp.allclose(out, ref, rtol=1e-5, atol=1e-5), (out, ref)

    # Second check: exercises multi-tile pipelining, the gated ragged-row mask,
    # deep buffering, and the out-of-kernel tail path.
    x2 = jax.random.normal(keys[2], (2, 4, 60, 101), dtype=jnp.float32)
    y2 = jax.random.normal(keys[3], (2, 4, 60, 101), dtype=jnp.float32)
    out2 = jax.block_until_ready(lp_l1_loss(x2, y2, block_rows=64))
    ref2 = jnp.sum(jnp.abs(x2 - y2)) / x2.shape[0]
    assert jnp.allclose(out2, ref2, rtol=1e-5, atol=1e-4), (out2, ref2)

    print("KERNEL_OK")
</pallas_src>

<mosaic_0001>
module attributes {stable_mosaic.version = 11 : i64} {
  func.func @kernel(%arg0: i32, %arg1: i32, %arg2: memref<16x128xf32, #tpu.memory_space<vmem>>, %arg3: memref<16x128xf32, #tpu.memory_space<vmem>>, %arg4: memref<1x1xf32, #tpu.memory_space<smem>>, %arg5: memref<8x128xf32, #tpu.memory_space<vmem>>) attributes {dimension_semantics = [#tpu.dimension_semantics<parallel>, #tpu.dimension_semantics<arbitrary>], iteration_bounds = array<i64: 1, 1>, scalar_prefetch = 0 : i64, scratch_operands = 1 : i64, tpu.core_type = #tpu.core_type<tc>, window_params = [{transform_indices = @transform_0, window_bounds = array<i64: 16, 128>}, {transform_indices = @transform_1, window_bounds = array<i64: 16, 128>}, {transform_indices = @transform_2, window_bounds = array<i64: 1, 1>}]} {
    %c0_i32 = arith.constant 0 : i32
    %0 = arith.cmpi eq, %arg1, %c0_i32 : i32
    %1 = arith.extui %0 : i1 to i32
    %c0_i32_0 = arith.constant 0 : i32
    %2 = arith.cmpi ne, %1, %c0_i32_0 : i32
    scf.if %2 {
      %cst_10 = arith.constant 0.000000e+00 : f32
      %15 = vector.broadcast %cst_10 : f32 to vector<8x128xf32>
      %c0_11 = arith.constant 0 : index
      %c0_12 = arith.constant 0 : index
      %16 = vector.load %arg5[%c0_11, %c0_12] : memref<8x128xf32, #tpu.memory_space<vmem>>, vector<8x128xf32>
      tpu.vector_store %arg5[%c0_11, %c0_12], %15 {strides = array<i32>} : memref<8x128xf32, #tpu.memory_space<vmem>>, vector<8x128xf32>,
    } else {
    }
    %c0 = arith.constant 0 : index
    %c0_1 = arith.constant 0 : index
    %3 = vector.load %arg2[%c0, %c0_1] : memref<16x128xf32, #tpu.memory_space<vmem>>, vector<16x128xf32>
    %c0_2 = arith.constant 0 : index
    %c0_3 = arith.constant 0 : index
    %4 = vector.load %arg3[%c0_2, %c0_3] : memref<16x128xf32, #tpu.memory_space<vmem>>, vector<16x128xf32>
    %5 = arith.subf %3, %4 : vector<16x128xf32>
    %6 = math.absf %5 : vector<16x128xf32>
    %c0_4 = arith.constant 0 : index
    %c0_5 = arith.constant 0 : index
    %7 = vector.load %arg5[%c0_4, %c0_5] : memref<8x128xf32, #tpu.memory_space<vmem>>, vector<8x128xf32>
    %8 = vector.shape_cast %6 : vector<16x128xf32> to vector<2x8x128xf32>
    %cst = arith.constant dense<0.000000e+00> : vector<8x128xf32>
    %9 = vector.multi_reduction <add>, %8, %cst [0] : vector<2x8x128xf32> to vector<8x128xf32>
    %10 = arith.addf %7, %9 : vector<8x128xf32>
    %c0_6 = arith.constant 0 : index
    %c0_7 = arith.constant 0 : index
    %11 = vector.load %arg5[%c0_6, %c0_7] : memref<8x128xf32, #tpu.memory_space<vmem>>, vector<8x128xf32>
    tpu.vector_store %arg5[%c0_6, %c0_7], %10 {strides = array<i32>} : memref<8x128xf32, #tpu.memory_space<vmem>>, vector<8x128xf32>,
    %c0_i32_8 = arith.constant 0 : i32
    %12 = arith.cmpi eq, %arg1, %c0_i32_8 : i32
    %13 = arith.extui %12 : i1 to i32
    %c0_i32_9 = arith.constant 0 : i32
    %14 = arith.cmpi ne, %13, %c0_i32_9 : i32
    scf.if %14 {
      %c0_10 = arith.constant 0 : index
      %c0_11 = arith.constant 0 : index
      %15 = vector.load %arg5[%c0_10, %c0_11] : memref<8x128xf32, #tpu.memory_space<vmem>>, vector<8x128xf32>
      %16 = vector.shape_cast %15 : vector<8x128xf32> to vector<1x8x128xf32>
      %cst_12 = arith.constant dense<0.000000e+00> : vector<1xf32>
      %17 = vector.multi_reduction <add>, %16, %cst_12 [1, 2] : vector<1x8x128xf32> to vector<1xf32>
      %18 = vector.shape_cast %17 : vector<1xf32> to vector<1x1x1xf32>
      %19 = vector.extract %18[0, 0, 0] : f32 from vector<1x1x1xf32>
      %c0_13 = arith.constant 0 : index
      %c0_14 = arith.constant 0 : index
      %20 = memref.load %arg4[%c0_13, %c0_14] : memref<1x1xf32, #tpu.memory_space<smem>>
      memref.store %19, %arg4[%c0_13, %c0_14] : memref<1x1xf32, #tpu.memory_space<smem>>
    } else {
    }
    return
  }
  func.func @transform_0(%arg0: i32, %arg1: i32) -> (i32, i32) {
    %c1_i32 = arith.constant 1 : i32
    %0 = arith.muli %arg0, %c1_i32 : i32
    %1 = arith.addi %0, %arg1 : i32
    %c0_i32 = arith.constant 0 : i32
    %c0_i32_0 = arith.constant 0 : i32
    return %1, %c0_i32 : i32, i32
  }
  func.func @transform_1(%arg0: i32, %arg1: i32) -> (i32, i32) {
    %c1_i32 = arith.constant 1 : i32
    %0 = arith.muli %arg0, %c1_i32 : i32
    %1 = arith.addi %0, %arg1 : i32
    %c0_i32 = arith.constant 0 : i32
    %c0_i32_0 = arith.constant 0 : i32
    return %1, %c0_i32 : i32, i32
  }
  func.func @transform_2(%arg0: i32, %arg1: i32) -> (i32, i32) {
    %c0_i32 = arith.constant 0 : i32
    %c0_i32_0 = arith.constant 0 : i32
    return %arg0, %c0_i32 : i32, i32
  }
}

</mosaic_0001>

<bundles_post_ra>
// kernel: tpu_custom_call.1
= control target key start
LH: loop header
LB: loop body
LE: loop exit
PB: predicated region body
PF: predicated region fallthrough
CT: control target
= control target key end

     0   :  { %7 = vsyncpa [#allocation4], 0  ;;  %s189_s0 = inlined_call_operand.hbm [shape: f32[16,128], index: 0, kind: input, shape index: {}]   ;;  %s190_s1 = inlined_call_operand.hbm [shape: f32[16,128], index: 1, kind: input, shape index: {}]   ;;  %s191_s2 = inlined_call_operand.hbm [shape: f32[1,1], index: 2, kind: output, shape index: {}]  }
   0x1   :  { %8 = vsyncpa [#allocation7], 0 }
   0x2   :  { %9 = vsyncpa [#allocation5], 0  ;;  %s160_s9 = smov [#allocation3]  }
   0x3   :  { %s19_s10 = sshll.u32 %s160_s9, 4  ;;  %s20_s10 = int_to_ptr.vmem [resolvable:$true] %s19_s10 }
   0x4   :  { %s114_s11 = scalar_lea.vmem %s20_s10, 256  ;;  %p119_p1 = scmp.lt.s32.totalorder %s20_s10, %s20_s10 }
   0x5   :  { %p115_p0 = scmp.ne.s32.totalorder %s20_s10, %s114_s11  ;;  %p120_p2 = scmp.lt.s32.totalorder %s114_s11, %s114_s11 }
   0x7   :  { %p121_p3 = por %p120_p2, %p119_p1 }
   0x9   :  { %p122_p4 = pnand %p121_p3, %p115_p0 }
   0xb   :  { %125 = shalt.err (!%p122_p4)
}
   0xc   :  { %s161_s12 = smov 128   ;;  %s162_s13 = smov 8  }
   0xd   :  { %25 = dma.hbm_to_vmem [thread:$0]  %s189_s0, 256, %s20_s10, [#allocation4], %s161_s12, %s161_s12, %s162_s13  }
   0xe   :  { %s163_s16 = smov [#allocation6]  }
   0xf   :  { %s35_s17 = sshll.u32 %s163_s16, 4  ;;  %s36_s17 = int_to_ptr.vmem [resolvable:$true] %s35_s17 }
  0x10   :  { %s134_s18 = scalar_lea.vmem %s36_s17, 256  ;;  %p139_p6 = scmp.lt.s32.totalorder %s36_s17, %s36_s17 }
  0x11   :  { %p135_p5 = scmp.ne.s32.totalorder %s36_s17, %s134_s18  ;;  %p140_p7 = scmp.lt.s32.totalorder %s134_s18, %s134_s18 }
  0x13   :  { %p141_p8 = por %p140_p7, %p139_p6 }
  0x15   :  { %p142_p9 = pnand %p141_p8, %p135_p5 }
  0x17   :  { %145 = shalt.err (!%p142_p9)
}
  0x18   :  { %41 = dma.hbm_to_vmem [thread:$0]  %s190_s1, 256, %s36_s17, [#allocation7], %s161_s12, %s161_s12, %s162_s13  }
  0x19   :  { %154 = dma.done.wait [#allocation4], 256  }
  0x1a   :  { %155 = vsyncadd [#allocation4], 4294967040 }
  0x1b   :  { %156 = dma.done.wait [#allocation7], 256  }
  0x1c   :  { %157 = vsyncadd [#allocation7], 4294967040  ;;  %v57_v0 = vld [vmem:[#allocation3] sm:$0xff]  ;;  %v58_v1 = vld [vmem:[#allocation3 + $0x8] sm:$0xff]  ;;  %s164_s1 = smov [#allocation8]  }
  0x1d   :  { %v59_v2 = vld [vmem:[#allocation6] sm:$0xff]  ;;  %v60_v3 = vld [vmem:[#allocation6 + $0x8] sm:$0xff] }
  0x1e   :  { %v61_v4 = vsub.f32 %v57_v0, %v59_v2  ;;  %v62_v5 = vsub.f32 %v58_v1, %v60_v3 }
  0x20   :  { %v63_v6 = vand.u32 2147483647, %v61_v4  ;;  %v64_v7 = vand.u32 2147483647, %v62_v5 }
  0x22   :  { %v66_v8 = vadd.f32 %v64_v7, %v63_v6 }
  0x24   :  { %73 = vadd.xlane.f32.xlu0 %v66_v8 }
  0xad   :  { %v74_v9 = vpop.xlane.xlu0 %73 }
  0xae   :  { %v75_v10 = vrot.slane %v74_v9, 4 }
  0xb0   :  { %v76_v11 = vadd.f32 %v75_v10, %v74_v9 }
  0xb2   :  { %v77_v12 = vrot.slane %v76_v11, 2 }
  0xb4   :  { %v78_v13 = vadd.f32 %v77_v12, %v76_v11 }
  0xb6   :  { %v79_v14 = vrot.slane %v78_v13, 1 }
  0xb8   :  { %v80_v15 = vadd.f32 %v79_v14, %v78_v13 }
  0xba   :  { %99 = vpush %v80_v15 }
  0xeb   :  { %s100_s0 = spop %99 }
  0xec   :  { %83 = sst [smem:[#allocation8]] %s100_s0 }
  0xed   :  { %91 = dma.smem_to_hbm %s164_s1, 16, %s191_s2, [#allocation5]  }
  0xee   :  { %158 = dma.done.wait [#allocation5], 16  }
  0xef   :  { %159 = vsyncadd [#allocation5], 4294967280 }
  0xf0   :  { %95 = sfence }
  0xf1   :  { %96 = vsyncpa [#allocation4], 1 }
  0xf2   :  { %97 = vsyncpa [#allocation7], 1 }
  0xf3   :  { %98 = vsyncpa [#allocation5], 1 }

</bundles_post_ra>
